<compile_context>
chip_gen: v5e
topology: v5e:2x2
jax: 0.10.0
libtpu: 0.0.40
codegen_flags: <defaults>
</compile_context>

<pallas_src>
import math
import numpy as np

import jax
import jax.numpy as jnp
from jax.experimental import pallas as pl
from jax.experimental.pallas import tpu as pltpu


# ----------------------------------------------------------------------------
# Deterministic Gaussian kernel construction (mirrors _get_2d_kernel, but uses
# math.erf instead of scipy.stats.norm.cdf).
# ----------------------------------------------------------------------------
def _norm_cdf(v):
    return 0.5 * (1.0 + math.erf(v / math.sqrt(2.0)))


def _get_2d_kernel(size, sigma):
    interval = (2.0 * sigma + 1.0) / size
    x = np.linspace(-sigma - interval / 2.0, sigma + interval / 2.0, size + 1)
    cdf = np.array([_norm_cdf(float(v)) for v in x], dtype=np.float64)
    kern1d = np.diff(cdf)
    kernel_raw = np.sqrt(np.outer(kern1d, kern1d))
    kernel = kernel_raw / kernel_raw.sum()
    return np.float32(kernel)  # (size, size); same kernel for every channel


# ----------------------------------------------------------------------------
# Host-side precompute: boundary-validity masks in the flattened (H*W,)
# lane-dense layout. One (4, HW) float32 array instead of (9, HW) weights.
#   row 0: left  neighbor (w-1) in bounds     row 2: upper neighbor (h-1) in bounds
#   row 1: right neighbor (w+1) in bounds     row 3: lower neighbor (h+1) in bounds
# ----------------------------------------------------------------------------
def _boundary_masks(H, W):
    r = np.arange(H)[:, None]
    c = np.arange(W)[None, :]
    lv = np.broadcast_to(c > 0, (H, W))
    rv = np.broadcast_to(c < W - 1, (H, W))
    tv = np.broadcast_to(r > 0, (H, W))
    bv = np.broadcast_to(r < H - 1, (H, W))
    return np.stack([m.reshape(H * W) for m in (lv, rv, tv, bv)],
                    axis=0).astype(np.float32)        # (4, HW)


# ----------------------------------------------------------------------------
# Pallas kernel: fused, symmetry-grouped DoG 3x3 stencil (4 lane rolls) +
# per-row normalization with the second min/max pass collapsed to scalars.
# ----------------------------------------------------------------------------
def _make_dog_kernel(H, W, w_m, w_e, w_c, eps=1e-8):
    HW = H * W
    s_left = 1 % HW            # roll shift that reads x[h, w-1]
    s_right = (HW - 1) % HW    # reads x[h, w+1]
    s_up = W % HW              # reads t[h-1, w]
    s_down = (HW - W) % HW     # reads t[h+1, w]

    def kernel(m_ref, x_ref, o_ref):
        x = x_ref[...].astype(jnp.float32)       # (rb, HW), lane-dense
        lv = m_ref[0:1, :]                       # tiny (1, HW) masks, sublane-bcast
        rv = m_ref[1:2, :]
        tv = m_ref[2:3, :]
        bv = m_ref[3:4, :]

        # dk is symmetric: w_c on the 4 corners, w_e on the 4 edges, w_m center.
        # Wrap-around of the lane rolls (across rows and across the image) is
        # zeroed by the validity masks -> exact zero-padded 3x3 conv.
        s1 = lv * pltpu.roll(x, s_left, 1) + rv * pltpu.roll(x, s_right, 1)
        t = w_e * x + w_c * s1
        acc = ((w_m * x + w_e * s1)
               + (tv * pltpu.roll(t, s_up, 1) + bv * pltpu.roll(t, s_down, 1)))
        dog = jnp.abs(acc)

        # abs_norm followed by 2 * min_max_norm, collapsed: after the first
        # pass min == 0 exactly and max == d/(d+eps), so the second pass is a
        # per-row scalar rescale: out = 2*(dog - mn) / (d + eps*(d + eps)).
        mx = jnp.max(dog, axis=-1, keepdims=True)   # (rb, 1)
        mn = jnp.min(dog, axis=-1, keepdims=True)
        d = mx - mn
        scale = 2.0 / (d + eps * (d + eps))         # tiny per-row divides
        o_ref[...] = ((dog - mn) * scale).astype(o_ref.dtype)

    return kernel


def _round_up(v, m):
    return -(-v // m) * m


def _pick_row_block(R, HW, sub, budget_bytes=4 << 20):
    """Rows per tile: a multiple of the sublane granularity, with each in/out
    buffer capped at ~4 MiB so double-buffered in+out plus in-kernel roll
    temporaries stay well under v7x's 64 MiB VMEM (v5e/v6e have 128 MiB and
    could go larger; one safe setting covers all generations). If the whole
    problem would fit one tile but has >= 2 sublane groups, split into two so
    the 'parallel' grid keeps both v7x TensorCores busy."""
    bytes_per_row = HW * 4                 # kernel math runs in f32
    cap = max(sub, budget_bytes // bytes_per_row // sub * sub)
    rb = min(cap, _round_up(R, sub))
    if rb >= R and R >= 2 * sub:
        rb = _round_up(-(-R // 2), sub)    # force >= 2 grid steps
    return rb


def gussian_lat_blk(x, index=0, eps=1e-8):
    """Pallas implementation of GussianLatBlk.forward for NCHW input."""
    N, C, H, W = x.shape
    HW = H * W
    R = N * C

    # Fused difference-of-Gaussians weights; dk is symmetric by construction
    # (average the 4 corners / 4 edges only to absorb fp rounding asymmetry).
    dk = (_get_2d_kernel(3, 3.0 * 0.9 ** index)
          - _get_2d_kernel(3, 3.0 * 0.9 ** (index + 1))).astype(np.float64)
    w_m = float(dk[1, 1])
    w_e = float((dk[0, 1] + dk[1, 0] + dk[1, 2] + dk[2, 1]) / 4.0)
    w_c = float((dk[0, 0] + dk[0, 2] + dk[2, 0] + dk[2, 2]) / 4.0)

    masks = jnp.asarray(_boundary_masks(H, W))       # (4, HW) float32

    itemsize = jnp.dtype(x.dtype).itemsize
    sub = 8 * max(1, 4 // itemsize)                  # f32: 8, bf16: 16, int8: 32
    rb = _pick_row_block(R, HW, sub)
    R_pad = _round_up(R, rb)

    x_rows = x.reshape(R, HW)                        # lane-dense layout plumbing
    if R_pad != R:
        x_rows = jnp.pad(x_rows, ((0, R_pad - R), (0, 0)))

    kernel = _make_dog_kernel(H, W, w_m, w_e, w_c, eps)
    out_rows = pl.pallas_call(
        kernel,
        out_shape=jax.ShapeDtypeStruct((R_pad, HW), x.dtype),
        grid=(R_pad // rb,),
        in_specs=[
            pl.BlockSpec((4, HW), lambda i: (0, 0)),     # boundary masks (tiny)
            pl.BlockSpec((rb, HW), lambda i: (i, 0)),    # input row tile
        ],
        out_specs=pl.BlockSpec((rb, HW), lambda i: (i, 0)),
        compiler_params=pltpu.CompilerParams(
            dimension_semantics=("parallel",),
            vmem_limit_bytes=48 * 1024 * 1024),
    )(masks, x_rows)

    return out_rows[:R].reshape(N, C, H, W)


# ----------------------------------------------------------------------------
# Pure-JAX reference: faithful to the PyTorch module (two separate blurs,
# abs_norm, then a full second min_max_norm) for a correctness check.
# ----------------------------------------------------------------------------
def _reference(x, index=0, eps=1e-8):
    N, C, H, W = x.shape
    k1 = jnp.asarray(_get_2d_kernel(3, 3.0 * 0.9 ** index))
    k2 = jnp.asarray(_get_2d_kernel(3, 3.0 * 0.9 ** (index + 1)))
    xp = jnp.pad(x, ((0, 0), (0, 0), (1, 1), (1, 1)))

    def blur(k):
        out = jnp.zeros_like(x)
        for dy in range(3):
            for dx in range(3):
                out = out + k[dy, dx] * xp[:, :, dy:dy + H, dx:dx + W]
        return out

    dog = jnp.abs(blur(k1) - blur(k2))
    mx = dog.max(axis=(2, 3), keepdims=True)
    mn = dog.min(axis=(2, 3), keepdims=True)
    dog = (dog - mn) / (mx - mn + eps)
    mx2 = dog.max(axis=(2, 3), keepdims=True)
    mn2 = dog.min(axis=(2, 3), keepdims=True)
    return 2.0 * (dog - mn2) / (mx2 - mn2 + eps)


if __name__ == "__main__":
    key = jax.random.PRNGKey(0)
    x = jax.random.normal(key, (2, 4, 16, 16), dtype=jnp.float32)

    out = jax.block_until_ready(gussian_lat_blk(x, index=0))
    ref = jax.block_until_ready(_reference(x, index=0))

    assert out.shape == (2, 4, 16, 16)
    # Tolerance modestly relaxed vs 1e-5: the kernel fuses (k1 - k2) into one
    # stencil, groups symmetric taps, and folds the second min/max pass into
    # exact scalar algebra, which reassociates the cancellation-heavy f32 DoG
    # arithmetic (errors ~1e-5-1e-6; a real bug — wrong tap/shift/border —
    # would be ~0.1-2.0).
    np.testing.assert_allclose(np.asarray(out), np.asarray(ref),
                               rtol=1e-4, atol=1e-4)
    print("KERNEL_OK")
</pallas_src>

<mosaic_0001>
module attributes {stable_mosaic.version = 11 : i64} {
  func.func @kernel(%arg0: i32, %arg1: memref<4x256xf32, #tpu.memory_space<vmem>>, %arg2: memref<8x256xf32, #tpu.memory_space<vmem>>, %arg3: memref<8x256xf32, #tpu.memory_space<vmem>>) attributes {dimension_semantics = [#tpu.dimension_semantics<parallel>], iteration_bounds = array<i64: 1>, scalar_prefetch = 0 : i64, scratch_operands = 0 : i64, tpu.core_type = #tpu.core_type<tc>, window_params = [{pipeline_mode = #tpu.pipeline_mode<synchronous>, transform_indices = @transform_0, window_bounds = array<i64: 4, 256>}, {transform_indices = @transform_1, window_bounds = array<i64: 8, 256>}, {transform_indices = @transform_2, window_bounds = array<i64: 8, 256>}]} {
    %c0 = arith.constant 0 : index
    %c0_0 = arith.constant 0 : index
    %0 = vector.load %arg2[%c0, %c0_0] : memref<8x256xf32, #tpu.memory_space<vmem>>, vector<8x256xf32>
    %c0_1 = arith.constant 0 : index
    %c0_2 = arith.constant 0 : index
    %1 = vector.load %arg1[%c0_1, %c0_2] : memref<4x256xf32, #tpu.memory_space<vmem>>, vector<1x256xf32>
    %c1 = arith.constant 1 : index
    %c0_3 = arith.constant 0 : index
    %2 = vector.load %arg1[%c1, %c0_3] : memref<4x256xf32, #tpu.memory_space<vmem>>, vector<1x256xf32>
    %c2 = arith.constant 2 : index
    %c0_4 = arith.constant 0 : index
    %3 = vector.load %arg1[%c2, %c0_4] : memref<4x256xf32, #tpu.memory_space<vmem>>, vector<1x256xf32>
    %c3 = arith.constant 3 : index
    %c0_5 = arith.constant 0 : index
    %4 = vector.load %arg1[%c3, %c0_5] : memref<4x256xf32, #tpu.memory_space<vmem>>, vector<1x256xf32>
    %c1_i32 = arith.constant 1 : i32
    %5 = tpu.dynamic_rotate %0 by %c1_i32 dim 1 : vector<8x256xf32>, i32 -> vector<8x256xf32>
    %6 = vector.broadcast %1 : vector<1x256xf32> to vector<8x256xf32>
    %7 = arith.mulf %6, %5 : vector<8x256xf32>
    %c255_i32 = arith.constant 255 : i32
    %8 = tpu.dynamic_rotate %0 by %c255_i32 dim 1 : vector<8x256xf32>, i32 -> vector<8x256xf32>
    %9 = vector.broadcast %2 : vector<1x256xf32> to vector<8x256xf32>
    %10 = arith.mulf %9, %8 : vector<8x256xf32>
    %11 = arith.addf %7, %10 : vector<8x256xf32>
    %cst = arith.constant -0.00339737535 : f32
    %12 = vector.broadcast %cst : f32 to vector<8x256xf32>
    %13 = arith.mulf %12, %0 : vector<8x256xf32>
    %cst_6 = arith.constant -0.00709869713 : f32
    %14 = vector.broadcast %cst_6 : f32 to vector<8x256xf32>
    %15 = arith.mulf %14, %11 : vector<8x256xf32>
    %16 = arith.addf %13, %15 : vector<8x256xf32>
    %cst_7 = arith.constant 0.0419843197 : f32
    %17 = vector.broadcast %cst_7 : f32 to vector<8x256xf32>
    %18 = arith.mulf %17, %0 : vector<8x256xf32>
    %cst_8 = arith.constant -0.00339737535 : f32
    %19 = vector.broadcast %cst_8 : f32 to vector<8x256xf32>
    %20 = arith.mulf %19, %11 : vector<8x256xf32>
    %21 = arith.addf %18, %20 : vector<8x256xf32>
    %c16_i32 = arith.constant 16 : i32
    %22 = tpu.dynamic_rotate %16 by %c16_i32 dim 1 : vector<8x256xf32>, i32 -> vector<8x256xf32>
    %23 = vector.broadcast %3 : vector<1x256xf32> to vector<8x256xf32>
    %24 = arith.mulf %23, %22 : vector<8x256xf32>
    %c240_i32 = arith.constant 240 : i32
    %25 = tpu.dynamic_rotate %16 by %c240_i32 dim 1 : vector<8x256xf32>, i32 -> vector<8x256xf32>
    %26 = vector.broadcast %4 : vector<1x256xf32> to vector<8x256xf32>
    %27 = arith.mulf %26, %25 : vector<8x256xf32>
    %28 = arith.addf %24, %27 : vector<8x256xf32>
    %29 = arith.addf %21, %28 : vector<8x256xf32>
    %30 = math.absf %29 : vector<8x256xf32>
    %cst_9 = arith.constant dense<0xFF800000> : vector<8xf32>
    %31 = vector.multi_reduction <maximumf>, %30, %cst_9 [1] : vector<8x256xf32> to vector<8xf32>
    %32 = vector.shape_cast %31 : vector<8xf32> to vector<8x1xf32>
    %cst_10 = arith.constant dense<0x7F800000> : vector<8xf32>
    %33 = vector.multi_reduction <minimumf>, %30, %cst_10 [1] : vector<8x256xf32> to vector<8xf32>
    %34 = vector.shape_cast %33 : vector<8xf32> to vector<8x1xf32>
    %35 = arith.subf %32, %34 : vector<8x1xf32>
    %cst_11 = arith.constant 9.99999993E-9 : f32
    %36 = vector.broadcast %cst_11 : f32 to vector<8x1xf32>
    %37 = arith.addf %35, %36 : vector<8x1xf32>
    %cst_12 = arith.constant 9.99999993E-9 : f32
    %38 = vector.broadcast %cst_12 : f32 to vector<8x1xf32>
    %39 = arith.mulf %38, %37 : vector<8x1xf32>
    %40 = arith.addf %35, %39 : vector<8x1xf32>
    %cst_13 = arith.constant 2.000000e+00 : f32
    %41 = vector.broadcast %cst_13 : f32 to vector<8x1xf32>
    %42 = arith.divf %41, %40 : vector<8x1xf32>
    %43 = vector.broadcast %34 : vector<8x1xf32> to vector<8x256xf32>
    %44 = arith.subf %30, %43 : vector<8x256xf32>
    %45 = vector.broadcast %42 : vector<8x1xf32> to vector<8x256xf32>
    %46 = arith.mulf %44, %45 : vector<8x256xf32>
    %c0_14 = arith.constant 0 : index
    %c0_15 = arith.constant 0 : index
    %47 = vector.load %arg3[%c0_14, %c0_15] : memref<8x256xf32, #tpu.memory_space<vmem>>, vector<8x256xf32>
    tpu.vector_store %arg3[%c0_14, %c0_15], %46 {strides = array<i32>} : memref<8x256xf32, #tpu.memory_space<vmem>>, vector<8x256xf32>,
    return
  }
  func.func @transform_0(%arg0: i32) -> (i32, i32) {
    %c0_i32 = arith.constant 0 : i32
    %c0_i32_0 = arith.constant 0 : i32
    %c0_i32_1 = arith.constant 0 : i32
    return %c0_i32, %c0_i32_0 : i32, i32
  }
  func.func @transform_1(%arg0: i32) -> (i32, i32) {
    %c0_i32 = arith.constant 0 : i32
    %c0_i32_0 = arith.constant 0 : i32
    return %arg0, %c0_i32 : i32, i32
  }
  func.func @transform_2(%arg0: i32) -> (i32, i32) {
    %c0_i32 = arith.constant 0 : i32
    %c0_i32_0 = arith.constant 0 : i32
    return %arg0, %c0_i32 : i32, i32
  }
}

</mosaic_0001>

<bundles_post_ra>
// kernel: tpu_custom_call.1
= control target key start
LH: loop header
LB: loop body
LE: loop exit
PB: predicated region body
PF: predicated region fallthrough
CT: control target
= control target key end

     0   :  { %7 = vsyncpa [#allocation3], 0  ;;  %s294_s0 = inlined_call_operand.hbm [shape: f32[4,256], index: 0, kind: input, shape index: {}]   ;;  %s295_s1 = inlined_call_operand.hbm [shape: f32[8,256], index: 1, kind: input, shape index: {}]   ;;  %s296_s2 = inlined_call_operand.hbm [shape: f32[8,256], index: 2, kind: output, shape index: {}]  }
   0x1   :  { %8 = vsyncpa [#allocation6], 0 }
   0x2   :  { %9 = vsyncpa [#allocation4], 0  ;;  %s15_s11 = sshll.u32 %s294_s0, 4  ;;  %s263_s12 = smov [#allocation2]   ;;  %s16_s11 = int_to_ptr.hbm [resolvable:$true] %s15_s11 }
   0x3   :  { %s17_s13 = sshll.u32 %s263_s12, 4  ;;  %s26_s16 = sshll.u32 %s295_s1, 4  ;;  %s18_s13 = int_to_ptr.vmem [resolvable:$true] %s17_s13  ;;  %s27_s16 = int_to_ptr.hbm [resolvable:$true] %s26_s16 }
   0x4   :  { %20 = dma.hbm_to_vmem [thread:$0]  %s16_s11, 128, %s18_s13, [#allocation3]  }
   0x5   :  { %s264_s17 = smov [#allocation5]  }
   0x6   :  { %s28_s18 = sshll.u32 %s264_s17, 4  ;;  %s29_s18 = int_to_ptr.vmem [resolvable:$true] %s28_s18 }
   0x7   :  { %31 = dma.hbm_to_vmem [thread:$0]  %s27_s16, 256, %s29_s18, [#allocation6]  }
   0x8   :  { %257 = dma.done.wait [#allocation3], 128  }
   0x9   :  { %258 = vsyncadd [#allocation3], 4294967168 }
   0xa   :  { %259 = dma.done.wait [#allocation6], 256  }
   0xb   :  { %260 = vsyncadd [#allocation6], 4294967040  ;;  %v40_v0 = vld [vmem:[#allocation5] sm:$0xff]  ;;  %s265_s0 = smov 127   ;;  %s266_s19 = smov 1   ;;  %v41_v1 = vld [vmem:[#allocation5 + $0x8] sm:$0xff]  ;;  %v53_v2 = vlaneseq }
   0xc   :  { %65 = vrot.lane.b32.xlu1 %v40_v0, %s265_s0  ;;  %49 = vrot.lane.b32.xlu0 %v40_v0, %s266_s19  ;;  %v44_v5 = vld [vmem:[#allocation2 + $0x1] ss:$4 sm:$0x3]  ;;  %v42_v7 = vld [vmem:[#allocation2] ss:$4 sm:$0x3] }
   0xd   :  { %v54_v6 = vand.u32 127, %v53_v2  ;;  %v73_v8 = vperm.slane %v44_v5, 0  ;;  %v74_v9 = vperm.slane %v44_v5, 1  ;;  %v59_v10 = vperm.slane %v42_v7, 0  ;;  %s267_s1 = smov 112   ;;  %s268_s20 = smov 16  }
   0xe   :  { %v60_v11 = vperm.slane %v42_v7, 1  ;;  %v82_v24 = vmul.f32 -0.0033973753, %v41_v1  ;;  %v81_v25 = vmul.f32 -0.0033973753, %v40_v0  ;;  %s269_s21 = smov [#allocation7]  }
   0xf   :  { %vm69_vm0 = vcmp.lt.s32.totalorder %v54_v6, 127  ;;  %vm55_vm1 = vcmp.lt.s32.totalorder %v54_v6, 1  ;;  %v46_v31 = vld [vmem:[#allocation2 + $0x2] ss:$4 sm:$0x3]  ;;  %vm97_vm2 = vcmp.lt.s32.totalorder %v54_v6, 16 }
  0x10   :  { %v48_v32 = vld [vmem:[#allocation2 + $0x3] ss:$4 sm:$0x3]  ;;  %v101_v34 = vperm.slane %v46_v31, 0  ;;  %v102_v35 = vperm.slane %v46_v31, 1  ;;  %vm111_vm3 = vcmp.lt.s32.totalorder %v54_v6, 112 }
  0x11   :  { %v115_v36 = vperm.slane %v48_v32, 0  ;;  %v116_v37 = vperm.slane %v48_v32, 1  ;;  %v87_v38 = vmul.f32 0.04198432, %v40_v0  ;;  %v88_v42 = vmul.f32 0.04198432, %v41_v1 }
  0x12   :  { %s163_s22 = sshll.u32 %s269_s21, 4  ;;  %s165_s25 = sshll.u32 %s296_s2, 4  ;;  %s164_s22 = int_to_ptr.vmem [resolvable:$true] %s163_s22  ;;  %s166_s25 = int_to_ptr.hbm [resolvable:$true] %s165_s25 }
  0x14   :  { %67 = vrot.lane.b32.xlu1 %v41_v1, %s265_s0  ;;  %51 = vrot.lane.b32.xlu0 %v41_v1, %s266_s19 }
  0x7e   :  { %v66_v3 = vpop.permute.xlu1 %65  ;;  %v50_v4 = vpop.permute.xlu0 %49 }
  0x86   :  { %v68_v12 = vpop.permute.xlu1 %67  ;;  %v52_v13 = vpop.permute.xlu0 %51 }
  0x87   :  { %v70_v14 = vsel %vm69_vm0, %v66_v3, %v68_v12  ;;  %v71_v15 = vsel %vm69_vm0, %v68_v12, %v66_v3  ;;  %v56_v16 = vsel %vm55_vm1, %v50_v4, %v52_v13  ;;  %v57_v17 = vsel %vm55_vm1, %v52_v13, %v50_v4 }
  0x88   :  { %v77_v18 = vmul.f32 %v73_v8, %v70_v14  ;;  %v78_v19 = vmul.f32 %v74_v9, %v71_v15  ;;  %v63_v20 = vmul.f32 %v59_v10, %v57_v17  ;;  %v64_v21 = vmul.f32 %v60_v11, %v56_v16 }
  0x8a   :  { %v79_v22 = vadd.f32 %v77_v18, %v63_v20  ;;  %v80_v23 = vadd.f32 %v78_v19, %v64_v21 }
  0x8c   :  { %v84_v26 = vmul.f32 -0.007098697, %v80_v23  ;;  %v83_v27 = vmul.f32 -0.007098697, %v79_v22  ;;  %v89_v43 = vmul.f32 -0.0033973753, %v79_v22 }
  0x8d   :  { %v90_v44 = vmul.f32 -0.0033973753, %v80_v23 }
  0x8e   :  { %v86_v28 = vadd.f32 %v84_v26, %v82_v24  ;;  %v85_v29 = vadd.f32 %v83_v27, %v81_v25  ;;  %v91_v54 = vadd.f32 %v89_v43, %v87_v38 }
  0x8f   :  { %v92_v55 = vadd.f32 %v90_v44, %v88_v42 }
  0x90   :  { %109 = vrot.lane.b32.xlu1 %v86_v28, %s267_s1  ;;  %107 = vrot.lane.b32.xlu0 %v85_v29, %s267_s1 }
  0x91   :  { %93 = vrot.lane.b32.xlu2 %v85_v29, %s268_s20 }
  0x99   :  { %95 = vrot.lane.b32.xlu2 %v86_v28, %s268_s20 }
  0xeb   :  { %v94_v30 = vpop.permute.xlu2 %93 }
  0xf3   :  { %v96_v33 = vpop.permute.xlu2 %95 }
  0xf4   :  { %v98_v39 = vsel %vm97_vm2, %v94_v30, %v96_v33  ;;  %v99_v40 = vsel %vm97_vm2, %v96_v33, %v94_v30 }
  0xf5   :  { %v105_v48 = vmul.f32 %v101_v34, %v99_v40  ;;  %v106_v49 = vmul.f32 %v102_v35, %v98_v39 }
 0x102   :  { %v110_v41 = vpop.permute.xlu1 %109  ;;  %v108_v45 = vpop.permute.xlu0 %107 }
 0x103   :  { %v112_v46 = vsel %vm111_vm3, %v108_v45, %v110_v41  ;;  %v113_v47 = vsel %vm111_vm3, %v110_v41, %v108_v45 }
 0x104   :  { %v119_v50 = vmul.f32 %v115_v36, %v112_v46  ;;  %v120_v51 = vmul.f32 %v116_v37, %v113_v47 }
 0x106   :  { %v121_v52 = vadd.f32 %v119_v50, %v105_v48  ;;  %v122_v53 = vadd.f32 %v120_v51, %v106_v49 }
 0x108   :  { %v123_v56 = vadd.f32 %v121_v52, %v91_v54  ;;  %v124_v57 = vadd.f32 %v122_v53, %v92_v55 }
 0x10a   :  { %v125_v58 = vand.u32 2147483647, %v123_v56  ;;  %v126_v59 = vand.u32 2147483647, %v124_v57 }
 0x10c   :  { %v130_v60 = vmin.f32 %v125_v58, %v126_v59  ;;  %v127_v61 = vmax.f32 %v125_v58, %v126_v59 }
 0x10e   :  { %131 = vmin.xlane.f32.xlu0 %v130_v60  ;;  %128 = vmax.xlane.f32.xlu2 %v127_v61 }
 0x181   :  { %v132_v62 = vpop.xlane.xlu0 %131  ;;  %v129_v63 = vpop.xlane.xlu2 %128 }
 0x182   :  { %v133_v0 = vsub.f32 %v129_v63, %v132_v62  ;;  %v152_v14 = vsub.f32 %v125_v58, %v132_v62  ;;  %v153_v15 = vsub.f32 %v126_v59, %v132_v62 }
 0x184   :  { %v134_v1 = vadd.f32 1e-08, %v133_v0 }
 0x186   :  { %v135_v2 = vmul.f32 1e-08, %v134_v1 }
 0x188   :  { %v136_v3 = vadd.f32 %v135_v2, %v133_v0 }
 0x18a   :  { %183 = vrcp.f32 %v136_v3  ;;  %v148_v7 = vand.u32 2147483648, %v136_v3  ;;  %v146_v9 = vand.u32 2147483647, %v136_v3  ;;  %vm142_vm5 = vweird.f32 %v136_v3 }
 0x18c   :  { %v149_v11 = vor.u32 1.1754944e-38, %v148_v7  ;;  %vm147_vm7 = vcmp.eq.f32.partialorder %v146_v9, 8.507059e+37 }
 0x190   :  { %v184_v4 = vpop.eup %183 }
 0x191   :  { %v138_v5 = vmul.f32 %v184_v4, %v136_v3  ;;  %vm143_vm4 = vweird.f32 %v184_v4 }
 0x192   :  { %vm144_vm6 = vmor %vm142_vm5, %vm143_vm4 }
 0x193   :  { %v139_v6 = vsub.f32 1.0, %v138_v5 }
 0x195   :  { %v140_v8 = vmul.f32 %v184_v4, %v139_v6 }
 0x197   :  { %v141_v10 = vadd.f32 %v184_v4, %v140_v8 }
 0x199   :  { %v145_v12 = vsel %vm144_vm6, %v184_v4, %v141_v10 }
 0x19a   :  { %v150_v13 = vsel %vm147_vm7, %v149_v11, %v145_v12 }
 0x19b   :  { %v151_v16 = vmul.f32 2.0, %v150_v13 }
 0x19d   :  { %v154_v17 = vmul.f32 %v152_v14, %v151_v16  ;;  %v155_v18 = vmul.f32 %v153_v15, %v151_v16 }
 0x19f   :  { %156 = vst [vmem:[#allocation7] sm:$0xff] %v154_v17 }
 0x1a0   :  { %157 = vst [vmem:[#allocation7 + $0x8] sm:$0xff] %v155_v18 }
 0x1a1   :  { %168 = dma.vmem_to_hbm [thread:$0]  %s164_s22, 256, %s166_s25, [#allocation4]  }
 0x1a2   :  { %261 = dma.done.wait [#allocation4], 256  }
 0x1a3   :  { %262 = vsyncadd [#allocation4], 4294967040 }
 0x1a4   :  { %173 = vsyncpa [#allocation3], 1 }
 0x1a5   :  { %174 = vsyncpa [#allocation6], 1 }
 0x1a6   :  { %175 = vsyncpa [#allocation4], 1 }

</bundles_post_ra>
